<compile_context>
chip_gen: v5e
topology: v5e:2x2
jax: 0.10.0
libtpu: 0.0.40
codegen_flags: <defaults>
</compile_context>

<pallas_src>
import functools
import math

import jax
import jax.numpy as jnp
from jax import lax
from jax.experimental import pallas as pl
from jax.experimental.pallas import tpu as pltpu

LOG_2PI = math.log(2.0 * math.pi)


def _round_up(x, m):
    return ((x + m - 1) // m) * m


def _elu(x):
    # ELU(alpha=1): x if x > 0 else exp(x)-1 (clamp so the discarded branch is finite)
    return jnp.where(x > 0, x, jnp.exp(jnp.minimum(x, 0.0)) - 1.0)


# ---------------------------------------------------------------------------
# Fused kernel
# ---------------------------------------------------------------------------
def _fused_kernel(x_ref, w_ref, sig_ref, out_ref, *, n_act, d, compute_dtype):
    """Fused ActorCritic forward on one batch tile.

    x_ref  : (bt, d) f32   lanes [0:A]=prev_actions, then obs_t|obs_c|obs,
                           one constant-1 bias lane, rest 0.
    w_ref  : (3d, d)       rows [0:d]=W1, [d:2d]=W2, [2d:3d]=W3, block-diagonal
                           with biases folded into the constant-lane row.
    sig_ref: (1, d) f32    1/sigma on action lanes, 0 elsewhere.
    out_ref: (bt, d) f32   lanes [0:A]=mu (tanh), [A]=value,
                           [A+1]=0.5*sum(((a-mu)/sigma)^2).
    """
    x = x_ref[...]                                     # (bt, d) f32
    xc = x.astype(compute_dtype)
    w1 = w_ref[0:d, :]
    w2 = w_ref[d:2 * d, :]
    w3 = w_ref[2 * d:3 * d, :]

    # Three fused (block-diagonal) layers -> 3 MXU passes total, f32 accumulate.
    h = _elu(jnp.dot(xc, w1, preferred_element_type=jnp.float32))
    h = _elu(jnp.dot(h.astype(compute_dtype), w2,
                     preferred_element_type=jnp.float32))
    h3 = jnp.dot(h.astype(compute_dtype), w3,
                 preferred_element_type=jnp.float32)   # (bt, d)

    lanes = lax.broadcasted_iota(jnp.int32, h3.shape, 1)
    # tanh only on the mu lanes; the value lane (n_act) passes through raw.
    out = jnp.where(lanes < n_act, jnp.tanh(h3), h3)

    # (prev_actions - mu) / sigma on action lanes; inv_sig is 0 elsewhere so the
    # obs / value / bias / pad lanes contribute nothing.
    inv_sig = sig_ref[...]                              # (1, d)
    diff = (x - out) * inv_sig
    nlp = 0.5 * jnp.sum(diff * diff, axis=-1, keepdims=True)        # (bt, 1)
    out = jnp.where(lanes == n_act + 1, nlp, out)

    out_ref[...] = out


# ---------------------------------------------------------------------------
# Parameter construction (mirrors the PyTorch __init__ inits)
# ---------------------------------------------------------------------------
def _orthogonal(key, out_dim, in_dim, gain):
    """torch.nn.init.orthogonal_ equivalent; returns (out_dim, in_dim)."""
    rows, cols = out_dim, in_dim
    if rows < cols:
        a = jax.random.normal(key, (cols, rows), dtype=jnp.float32)
    else:
        a = jax.random.normal(key, (rows, cols), dtype=jnp.float32)
    q, r = jnp.linalg.qr(a)
    q = q * jnp.sign(jnp.diagonal(r))[None, :]
    if rows < cols:
        q = q.T
    return (gain * q).astype(jnp.float32)


def make_params(key, obs_dim, units, actions_num):
    """Weights in (in, out) layout; biases / sigmas as (1, out)."""
    in_t, in_c = obs_dim - 12, obs_dim - 2
    n_t, n_c = actions_num - 12, actions_num - 6
    u0, u1 = units
    gain = math.sqrt(2.0)
    keys = jax.random.split(key, 16)

    def lin(k, i, o, g):
        return _orthogonal(k, o, i, g).T, jnp.zeros((1, o), jnp.float32)

    wt1, bt1 = lin(keys[0], in_t, u0, gain)
    wt2, bt2 = lin(keys[1], u0, u1, gain)
    wc1, bc1 = lin(keys[2], in_c, u0, gain)
    wc2, bc2 = lin(keys[3], u0, u1, gain)
    wv1, bv1 = lin(keys[4], obs_dim, u0, gain)
    wv2, bv2 = lin(keys[5], u0, u1, gain)
    wmt, bmt = lin(keys[6], u1, n_t, 0.01)
    wmc, bmc = lin(keys[7], u1, n_c, 0.01)
    wval, bval = lin(keys[8], u1, 1, 1.0)
    sig_t = jnp.zeros((1, n_t), jnp.float32)      # nn.init.constant_(sigma_t, 0)
    sig_c = jnp.zeros((1, n_c), jnp.float32)

    return (wt1, bt1, wt2, bt2, wc1, bc1, wc2, bc2,
            wv1, bv1, wv2, bv2, wmt, bmt, wmc, bmc,
            wval, bval, sig_t, sig_c)


def pack_params(params, obs_dim, units, actions_num, *, dtype=jnp.bfloat16):
    """Block-diagonal fusion of all weights into one (3D, D) slab.

    Called ONCE per parameter update (outside the jitted forward).
    Biases are folded into a constant-1 input lane; returns
    (slab, inv_sigma_row, logstd, d).
    """
    (wt1, bt1, wt2, bt2, wc1, bc1, wc2, bc2,
     wv1, bv1, wv2, bv2, wmt, bmt, wmc, bmc,
     wval, bval, sig_t, sig_c) = params
    in_t, in_c, in_v = obs_dim - 12, obs_dim - 2, obs_dim
    n_t, n_c = actions_num - 12, actions_num - 6
    A = n_t + n_c
    u0, u1 = units

    used0 = A + in_t + in_c + in_v                 # first free lane -> bias lane
    # Keep d at 128 lanes whenever everything fits (advisory: don't grow to 256).
    d = _round_up(max(used0 + 1, 3 * u0 + 1, 3 * u1 + 1, A + 2), 128)

    # input lane layout: [0:A]=prev_actions, then obs_t, obs_c, obs, 1.0
    o_t = A
    o_c = o_t + in_t
    o_v = o_c + in_c
    bias_in, bias_h1, bias_h2 = used0, 3 * u0, 3 * u1

    w1 = jnp.zeros((d, d), jnp.float32)
    w1 = w1.at[o_t:o_t + in_t, 0:u0].set(wt1)
    w1 = w1.at[o_c:o_c + in_c, u0:2 * u0].set(wc1)
    w1 = w1.at[o_v:o_v + in_v, 2 * u0:3 * u0].set(wv1)
    w1 = w1.at[bias_in, 0:u0].set(bt1[0])
    w1 = w1.at[bias_in, u0:2 * u0].set(bc1[0])
    w1 = w1.at[bias_in, 2 * u0:3 * u0].set(bv1[0])
    w1 = w1.at[bias_in, bias_h1].set(1.0)          # regenerate constant lane

    w2 = jnp.zeros((d, d), jnp.float32)
    w2 = w2.at[0:u0, 0:u1].set(wt2)
    w2 = w2.at[u0:2 * u0, u1:2 * u1].set(wc2)
    w2 = w2.at[2 * u0:3 * u0, 2 * u1:3 * u1].set(wv2)
    w2 = w2.at[bias_h1, 0:u1].set(bt2[0])
    w2 = w2.at[bias_h1, u1:2 * u1].set(bc2[0])
    w2 = w2.at[bias_h1, 2 * u1:3 * u1].set(bv2[0])
    w2 = w2.at[bias_h1, bias_h2].set(1.0)          # regenerate constant lane

    # head lane layout: [0:n_t]=mu_t, [n_t:A]=mu_c, [A]=value
    w3 = jnp.zeros((d, d), jnp.float32)
    w3 = w3.at[0:u1, 0:n_t].set(wmt)
    w3 = w3.at[u1:2 * u1, n_t:A].set(wmc)
    w3 = w3.at[2 * u1:3 * u1, A:A + 1].set(wval)
    w3 = w3.at[bias_h2, 0:n_t].set(bmt[0])
    w3 = w3.at[bias_h2, n_t:A].set(bmc[0])
    w3 = w3.at[bias_h2, A].set(bval[0, 0])

    slab = jnp.concatenate([w1, w2, w3], axis=0).astype(dtype)       # (3d, d)

    logstd = jnp.concatenate([sig_t, sig_c], axis=-1)                # (1, A)
    inv_sig = jnp.zeros((1, d), jnp.float32).at[:, 0:A].set(jnp.exp(-logstd))
    return slab, inv_sig, logstd, d


# ---------------------------------------------------------------------------
# Wrapper (jitted; packing of params is done outside and passed in)
# ---------------------------------------------------------------------------
@functools.partial(jax.jit, static_argnames=("batch_tile",))
def actor_critic_forward(slab, inv_sig, logstd, obs, obs_t, obs_c, prev_actions,
                         batch_tile=1024):
    B = obs.shape[0]
    d = slab.shape[1]
    A = logstd.shape[-1]

    # Balanced batch tiles; keep >=2 grid steps for large batches (v7x megacore).
    n_tiles = pl.cdiv(B, batch_tile)
    if n_tiles == 1 and B > 256:
        n_tiles = 2
    bt = _round_up(pl.cdiv(B, n_tiles), 8)
    B_pad = _round_up(B, bt)

    # Single fused packing pass: prev_actions | obs_t | obs_c | obs | 1.0, padded.
    packed = jnp.concatenate(
        [prev_actions, obs_t, obs_c, obs, jnp.ones((B, 1), jnp.float32)],
        axis=-1).astype(jnp.float32)
    x = jnp.pad(packed, ((0, B_pad - B), (0, d - packed.shape[-1])))

    kernel = functools.partial(_fused_kernel, n_act=A, d=d,
                               compute_dtype=slab.dtype)
    out = pl.pallas_call(
        kernel,
        out_shape=jax.ShapeDtypeStruct((B_pad, d), jnp.float32),
        grid_spec=pltpu.PrefetchScalarGridSpec(
            num_scalar_prefetch=0,
            grid=(B_pad // bt,),
            in_specs=[
                pl.BlockSpec((bt, d), lambda i: (i, 0)),        # activations
                pl.BlockSpec((3 * d, d), lambda i: (0, 0)),     # resident weights
                pl.BlockSpec((1, d), lambda i: (0, 0)),         # resident 1/sigma
            ],
            out_specs=pl.BlockSpec((bt, d), lambda i: (i, 0)),
        ),
        compiler_params=pltpu.CompilerParams(
            dimension_semantics=("parallel",)),
    )(x, slab, inv_sig)

    out = out[:B]
    mu = out[:, 0:A]
    value = out[:, A:A + 1]

    # Constant-per-row pieces (depend only on sigma params) hoisted to the wrapper.
    nlp_const = jnp.sum(logstd) + 0.5 * A * LOG_2PI
    prev_neglogp = out[:, A + 1] + nlp_const
    sigma = jnp.broadcast_to(jnp.exp(logstd), (B, A))
    entropy = jnp.broadcast_to(jnp.sum(0.5 + 0.5 * LOG_2PI + logstd), (B,))

    return {
        "prev_neglogp": prev_neglogp,   # (B,)
        "values": value,                # (B, 1)
        "entropy": entropy,             # (B,)
        "mus": mu,                      # (B, A)
        "sigmas": sigma,                # (B, A)
    }


# ---------------------------------------------------------------------------
# Pure-JAX reference (unfused math) for a correctness check.
# ---------------------------------------------------------------------------
def reference_forward(params, obs, obs_t, obs_c, prev_actions):
    (wt1, bt1, wt2, bt2, wc1, bc1, wc2, bc2,
     wv1, bv1, wv2, bv2, wmt, bmt, wmc, bmc,
     wval, bval, sig_t, sig_c) = params

    def elu(x):
        return jnp.where(x > 0, x, jnp.exp(jnp.minimum(x, 0.0)) - 1.0)

    def mlp2(x, w1, b1, w2, b2):
        return elu(elu(x @ w1 + b1) @ w2 + b2)

    mu_t = jnp.tanh(mlp2(obs_t, wt1, bt1, wt2, bt2) @ wmt + bmt)
    mu_c = jnp.tanh(mlp2(obs_c, wc1, bc1, wc2, bc2) @ wmc + bmc)
    value = mlp2(obs, wv1, bv1, wv2, bv2) @ wval + bval
    mu = jnp.concatenate([mu_t, mu_c], axis=-1)
    logstd = jnp.concatenate([mu_t * 0 + sig_t, mu_c * 0 + sig_c], axis=-1)
    sigma = jnp.exp(logstd)
    logp = -0.5 * ((prev_actions - mu) / sigma) ** 2 - logstd - 0.5 * LOG_2PI
    entropy = jnp.sum(0.5 + 0.5 * LOG_2PI + logstd, axis=-1)
    return {
        "prev_neglogp": -jnp.sum(logp, axis=-1),
        "values": value,
        "entropy": entropy,
        "mus": mu,
        "sigmas": sigma,
    }


if __name__ == "__main__":
    # Small config consistent with the module:
    #   input_shape = (32,) -> value in = 32, actor_t in = 20, actor_c in = 30
    #   actor_units = [32, 32]; actions_num = 18 -> mu_t=6, mu_c=12, A=18
    B = 2
    OBS_DIM = 32
    UNITS = (32, 32)
    ACTIONS_NUM = 18
    A = (ACTIONS_NUM - 12) + (ACTIONS_NUM - 6)

    key = jax.random.PRNGKey(0)
    k_params, k_obs, k_t, k_c, k_pa = jax.random.split(key, 5)

    params = make_params(k_params, OBS_DIM, UNITS, ACTIONS_NUM)
    obs = jax.random.normal(k_obs, (B, OBS_DIM), dtype=jnp.float32)
    obs_t = jax.random.normal(k_t, (B, OBS_DIM - 12), dtype=jnp.float32)
    obs_c = jax.random.normal(k_c, (B, OBS_DIM - 2), dtype=jnp.float32)
    prev_actions = jax.random.normal(k_pa, (B, A), dtype=jnp.float32)

    ref = reference_forward(params, obs, obs_t, obs_c, prev_actions)

    # f32 slab: exact-semantics check; bf16 slab (default fast path): loose check.
    for dtype, tol in ((jnp.float32, 1e-3), (jnp.bfloat16, 3e-2)):
        slab, inv_sig, logstd, _ = pack_params(
            params, OBS_DIM, UNITS, ACTIONS_NUM, dtype=dtype)
        out = actor_critic_forward(slab, inv_sig, logstd,
                                   obs, obs_t, obs_c, prev_actions)
        out = jax.tree_util.tree_map(jax.block_until_ready, out)
        for name in ("prev_neglogp", "values", "entropy", "mus", "sigmas"):
            assert out[name].shape == ref[name].shape, (
                name, out[name].shape, ref[name].shape)
            assert jnp.allclose(out[name], ref[name], rtol=tol, atol=tol), (
                name, dtype)

    print("KERNEL_OK")
</pallas_src>

<mosaic_0001>
module attributes {stable_mosaic.version = 11 : i64} {
  func.func @_fused_kernel(%arg0: i32, %arg1: memref<8x128xf32, #tpu.memory_space<vmem>>, %arg2: memref<384x128xf32, #tpu.memory_space<vmem>>, %arg3: memref<1x128xf32, #tpu.memory_space<vmem>>, %arg4: memref<8x128xf32, #tpu.memory_space<vmem>>) attributes {dimension_semantics = [#tpu.dimension_semantics<parallel>], iteration_bounds = array<i64: 1>, scalar_prefetch = 0 : i64, scratch_operands = 0 : i64, tpu.core_type = #tpu.core_type<tc>, window_params = [{transform_indices = @transform_0, window_bounds = array<i64: 8, 128>}, {pipeline_mode = #tpu.pipeline_mode<synchronous>, transform_indices = @transform_1, window_bounds = array<i64: 384, 128>}, {pipeline_mode = #tpu.pipeline_mode<synchronous>, transform_indices = @transform_2, window_bounds = array<i64: 1, 128>}, {transform_indices = @transform_3, window_bounds = array<i64: 8, 128>}]} {
    %c0 = arith.constant 0 : index
    %c0_0 = arith.constant 0 : index
    %0 = vector.load %arg1[%c0, %c0_0] : memref<8x128xf32, #tpu.memory_space<vmem>>, vector<8x128xf32>
    %c0_1 = arith.constant 0 : index
    %c0_2 = arith.constant 0 : index
    %1 = vector.load %arg2[%c0_1, %c0_2] : memref<384x128xf32, #tpu.memory_space<vmem>>, vector<128x128xf32>
    %c128 = arith.constant 128 : index
    %c0_3 = arith.constant 0 : index
    %2 = vector.load %arg2[%c128, %c0_3] : memref<384x128xf32, #tpu.memory_space<vmem>>, vector<128x128xf32>
    %c256 = arith.constant 256 : index
    %c0_4 = arith.constant 0 : index
    %3 = vector.load %arg2[%c256, %c0_4] : memref<384x128xf32, #tpu.memory_space<vmem>>, vector<128x128xf32>
    %cst = arith.constant dense<0.000000e+00> : vector<8x128xf32>
    %4 = tpu.matmul %0, %1, %cst {dimension_numbers = #tpu.dot_dimension_numbers<[1], [0], [0], [1], [0, 0, 1, 1], [], []>} : vector<8x128xf32>, vector<128x128xf32>, vector<8x128xf32> -> vector<8x128xf32>
    %cst_5 = arith.constant 0.000000e+00 : f32
    %5 = vector.broadcast %cst_5 : f32 to vector<8x128xf32>
    %6 = arith.cmpf ogt, %4, %5 : vector<8x128xf32>
    %cst_6 = arith.constant 0.000000e+00 : f32
    %7 = vector.broadcast %cst_6 : f32 to vector<8x128xf32>
    %8 = arith.minimumf %4, %7 : vector<8x128xf32>
    %9 = math.exp %8 : vector<8x128xf32>
    %cst_7 = arith.constant 1.000000e+00 : f32
    %10 = vector.broadcast %cst_7 : f32 to vector<8x128xf32>
    %11 = arith.subf %9, %10 : vector<8x128xf32>
    %12 = arith.select %6, %4, %11 : vector<8x128xi1>, vector<8x128xf32>
    %cst_8 = arith.constant dense<0.000000e+00> : vector<8x128xf32>
    %13 = tpu.matmul %12, %2, %cst_8 {dimension_numbers = #tpu.dot_dimension_numbers<[1], [0], [0], [1], [0, 0, 1, 1], [], []>} : vector<8x128xf32>, vector<128x128xf32>, vector<8x128xf32> -> vector<8x128xf32>
    %cst_9 = arith.constant 0.000000e+00 : f32
    %14 = vector.broadcast %cst_9 : f32 to vector<8x128xf32>
    %15 = arith.cmpf ogt, %13, %14 : vector<8x128xf32>
    %cst_10 = arith.constant 0.000000e+00 : f32
    %16 = vector.broadcast %cst_10 : f32 to vector<8x128xf32>
    %17 = arith.minimumf %13, %16 : vector<8x128xf32>
    %18 = math.exp %17 : vector<8x128xf32>
    %cst_11 = arith.constant 1.000000e+00 : f32
    %19 = vector.broadcast %cst_11 : f32 to vector<8x128xf32>
    %20 = arith.subf %18, %19 : vector<8x128xf32>
    %21 = arith.select %15, %13, %20 : vector<8x128xi1>, vector<8x128xf32>
    %cst_12 = arith.constant dense<0.000000e+00> : vector<8x128xf32>
    %22 = tpu.matmul %21, %3, %cst_12 {dimension_numbers = #tpu.dot_dimension_numbers<[1], [0], [0], [1], [0, 0, 1, 1], [], []>} : vector<8x128xf32>, vector<128x128xf32>, vector<8x128xf32> -> vector<8x128xf32>
    %23 = tpu.iota {dimensions = array<i32: 1>} : vector<8x128xi32>
    %c18_i32 = arith.constant 18 : i32
    %24 = vector.broadcast %c18_i32 : i32 to vector<8x128xi32>
    %25 = arith.cmpi slt, %23, %24 : vector<8x128xi32>
    %26 = math.tanh %22 : vector<8x128xf32>
    %27 = arith.select %25, %26, %22 : vector<8x128xi1>, vector<8x128xf32>
    %c0_13 = arith.constant 0 : index
    %c0_14 = arith.constant 0 : index
    %28 = vector.load %arg3[%c0_13, %c0_14] : memref<1x128xf32, #tpu.memory_space<vmem>>, vector<1x128xf32>
    %29 = arith.subf %0, %27 : vector<8x128xf32>
    %30 = vector.broadcast %28 : vector<1x128xf32> to vector<8x128xf32>
    %31 = arith.mulf %29, %30 : vector<8x128xf32>
    %32 = arith.mulf %31, %31 : vector<8x128xf32>
    %cst_15 = arith.constant dense<0.000000e+00> : vector<8xf32>
    %33 = vector.multi_reduction <add>, %32, %cst_15 [1] : vector<8x128xf32> to vector<8xf32>
    %34 = vector.shape_cast %33 : vector<8xf32> to vector<8x1xf32>
    %cst_16 = arith.constant 5.000000e-01 : f32
    %35 = vector.broadcast %cst_16 : f32 to vector<8x1xf32>
    %36 = arith.mulf %35, %34 : vector<8x1xf32>
    %c19_i32 = arith.constant 19 : i32
    %37 = vector.broadcast %c19_i32 : i32 to vector<8x128xi32>
    %38 = arith.cmpi eq, %23, %37 : vector<8x128xi32>
    %39 = vector.shape_cast %36 : vector<8x1xf32> to vector<8x1xf32>
    %40 = vector.broadcast %39 : vector<8x1xf32> to vector<8x128xf32>
    %41 = arith.select %38, %40, %27 : vector<8x128xi1>, vector<8x128xf32>
    %c0_17 = arith.constant 0 : index
    %c0_18 = arith.constant 0 : index
    %42 = vector.load %arg4[%c0_17, %c0_18] : memref<8x128xf32, #tpu.memory_space<vmem>>, vector<8x128xf32>
    tpu.vector_store %arg4[%c0_17, %c0_18], %41 {strides = array<i32>} : memref<8x128xf32, #tpu.memory_space<vmem>>, vector<8x128xf32>,
    return
  }
  func.func @transform_0(%arg0: i32) -> (i32, i32) {
    %c0_i32 = arith.constant 0 : i32
    %c0_i32_0 = arith.constant 0 : i32
    return %arg0, %c0_i32 : i32, i32
  }
  func.func @transform_1(%arg0: i32) -> (i32, i32) {
    %c0_i32 = arith.constant 0 : i32
    %c0_i32_0 = arith.constant 0 : i32
    %c0_i32_1 = arith.constant 0 : i32
    return %c0_i32, %c0_i32_0 : i32, i32
  }
  func.func @transform_2(%arg0: i32) -> (i32, i32) {
    %c0_i32 = arith.constant 0 : i32
    %c0_i32_0 = arith.constant 0 : i32
    %c0_i32_1 = arith.constant 0 : i32
    return %c0_i32, %c0_i32_0 : i32, i32
  }
  func.func @transform_3(%arg0: i32) -> (i32, i32) {
    %c0_i32 = arith.constant 0 : i32
    %c0_i32_0 = arith.constant 0 : i32
    return %arg0, %c0_i32 : i32, i32
  }
}

</mosaic_0001>

<bundles_post_ra>
// kernel: actor_critic_forward.1
= control target key start
LH: loop header
LB: loop body
LE: loop exit
PB: predicated region body
PF: predicated region fallthrough
CT: control target
= control target key end

     0   :  { %8 = vsyncpa [#allocation3], 0  ;;  %s212_s15 = smov [#allocation2]   ;;  %s213_s17 = smov 128   ;;  %s251_s0 = inlined_call_operand.vmem [shape: f32[8,128], index: 0, kind: input, shape index: {}]   ;;  %s252_s1 = inlined_call_operand.hbm [shape: f32[384,128], index: 1, kind: input, shape index: {}]   ;;  %s253_s2 = inlined_call_operand.vmem [shape: f32[1,128], index: 2, kind: input, shape index: {}]   ;;  %s254_s3 = inlined_call_operand.vmem [shape: f32[8,128], index: 3, kind: output, shape index: {}]  }
   0x1   :  { %s15_s14 = sshll.u32 %s252_s1, 4  ;;  %s17_s16 = sshll.u32 %s212_s15, 4  ;;  %s16_s14 = int_to_ptr.hbm [resolvable:$true] %s15_s14  ;;  %s18_s16 = int_to_ptr.vmem [resolvable:$true] %s17_s16 }
   0x2   :  { %s214_s18 = smov 8  }
   0x3   :  { %23 = dma.hbm_to_vmem [thread:$0]  %s16_s14, 6144, %s18_s16, [#allocation3], %s213_s17, %s213_s17, %s214_s18  }
   0x4   :  { %210 = dma.done.wait [#allocation3], 6144  }
   0x5   :  { %211 = vsyncadd [#allocation3], 4294961152  ;;  %v46_v0 = vld [vmem:[#allocation2 + $0x78] sm:$0xff]  ;;  %v45_v1 = vld [vmem:[#allocation2 + $0x70] sm:$0xff]  ;;  %v151_v61 = vlaneseq }
   0x6   :  { %79 = vmatpush.msra.mxu0 %v46_v0  ;;  %v44_v2 = vld [vmem:[#allocation2 + $0x68] sm:$0xff]  ;;  %v43_v3 = vld [vmem:[#allocation2 + $0x60] sm:$0xff]  ;;  %v62_v4 = vld [vmem:[#allocation2 + $0xf8] sm:$0xff] }
   0x7   :  { %v42_v5 = vld [vmem:[#allocation2 + $0x58] sm:$0xff]  ;;  %105 = vmatpush.msra.mxu1 %v62_v4  ;;  %v61_v6 = vld [vmem:[#allocation2 + $0xf0] sm:$0xff]  ;;  %v60_v7 = vld [vmem:[#allocation2 + $0xe8] sm:$0xff]  ;;  %v152_v63 = vand.u32 127, %v151_v61 }
   0x8   :  { %80 = vmatpush.msra.mxu0 %v45_v1  ;;  %v41_v8 = vld [vmem:[#allocation2 + $0x50] sm:$0xff]  ;;  %v59_v9 = vld [vmem:[#allocation2 + $0xe0] sm:$0xff]  ;;  %v40_v10 = vld [vmem:[#allocation2 + $0x48] sm:$0xff] }
   0x9   :  { %106 = vmatpush.msra.mxu1 %v61_v6  ;;  %v58_v11 = vld [vmem:[#allocation2 + $0xd8] sm:$0xff]  ;;  %v39_v12 = vld [vmem:[#allocation2 + $0x40] sm:$0xff]  ;;  %v57_v13 = vld [vmem:[#allocation2 + $0xd0] sm:$0xff]  ;;  %vm153_vm2 = vcmp.lt.s32.totalorder %v152_v63, 18  ;;  %vm166_vm3 = vcmp.eq.s32.totalorder %v152_v63, 19 }
   0xa   :  { %81 = vmatpush.msra.mxu0 %v44_v2  ;;  %v38_v14 = vld [vmem:[#allocation2 + $0x38] sm:$0xff]  ;;  %v56_v15 = vld [vmem:[#allocation2 + $0xc8] sm:$0xff]  ;;  %v37_v16 = vld [vmem:[#allocation2 + $0x30] sm:$0xff] }
   0xb   :  { %107 = vmatpush.msra.mxu1 %v60_v7  ;;  %v55_v17 = vld [vmem:[#allocation2 + $0xc0] sm:$0xff]  ;;  %v36_v18 = vld [vmem:[#allocation2 + $0x28] sm:$0xff]  ;;  %v34_v20 = vld [vmem:[#allocation2 + $0x18] sm:$0xff] }
   0xc   :  { %82 = vmatpush.msra.mxu0 %v43_v3  ;;  %v35_v19 = vld [vmem:[#allocation2 + $0x20] sm:$0xff]  ;;  %v33_v21 = vld [vmem:[#allocation2 + $0x10] sm:$0xff]  ;;  %v32_v22 = vld [vmem:[#allocation2 + $0x8] sm:$0xff] }
   0xd   :  { %108 = vmatpush.msra.mxu1 %v59_v9  ;;  %v31_v23 = vld [vmem:[#allocation2] sm:$0xff]  ;;  %v54_v25 = vld [vmem:[#allocation2 + $0xb8] sm:$0xff]  ;;  %v53_v26 = vld [vmem:[#allocation2 + $0xb0] sm:$0xff] }
   0xe   :  { %83 = vmatpush.msra.mxu0 %v42_v5  ;;  %v241_v24 = vld [vmem:[%s251_s0] sm:$0xff]  ;;  %v52_v27 = vld [vmem:[#allocation2 + $0xa8] sm:$0xff]  ;;  %v50_v29 = vld [vmem:[#allocation2 + $0x98] sm:$0xff] }
   0xf   :  { %109 = vmatpush.msra.mxu1 %v58_v11  ;;  %v51_v28 = vld [vmem:[#allocation2 + $0xa0] sm:$0xff]  ;;  %v49_v30 = vld [vmem:[#allocation2 + $0x90] sm:$0xff]  ;;  %v48_v31 = vld [vmem:[#allocation2 + $0x88] sm:$0xff] }
  0x10   :  { %84 = vmatpush.msra.mxu0 %v41_v8  ;;  %v47_v32 = vld [vmem:[#allocation2 + $0x80] sm:$0xff]  ;;  %v78_v33 = vld [vmem:[#allocation2 + $0x178] sm:$0xff]  ;;  %v77_v34 = vld [vmem:[#allocation2 + $0x170] sm:$0xff] }
  0x11   :  { %110 = vmatpush.msra.mxu1 %v57_v13  ;;  %131 = vmatpush.msra.mxu2 %v78_v33  ;;  %v76_v35 = vld [vmem:[#allocation2 + $0x168] sm:$0xff]  ;;  %v75_v36 = vld [vmem:[#allocation2 + $0x160] sm:$0xff]  ;;  %v74_v37 = vld [vmem:[#allocation2 + $0x158] sm:$0xff] }
  0x12   :  { %85 = vmatpush.msra.mxu0 %v40_v10  ;;  %v73_v38 = vld [vmem:[#allocation2 + $0x150] sm:$0xff]  ;;  %v72_v39 = vld [vmem:[#allocation2 + $0x148] sm:$0xff]  ;;  %v71_v40 = vld [vmem:[#allocation2 + $0x140] sm:$0xff] }
  0x13   :  { %111 = vmatpush.msra.mxu1 %v56_v15  ;;  %132 = vmatpush.msra.mxu2 %v77_v34  ;;  %v70_v47 = vld [vmem:[#allocation2 + $0x138] sm:$0xff]  ;;  %v69_v48 = vld [vmem:[#allocation2 + $0x130] sm:$0xff]  ;;  %v68_v49 = vld [vmem:[#allocation2 + $0x128] sm:$0xff] }
  0x14   :  { %86 = vmatpush.msra.mxu0 %v39_v12  ;;  %v67_v50 = vld [vmem:[#allocation2 + $0x120] sm:$0xff]  ;;  %v66_v51 = vld [vmem:[#allocation2 + $0x118] sm:$0xff]  ;;  %v65_v52 = vld [vmem:[#allocation2 + $0x110] sm:$0xff] }
  0x15   :  { %112 = vmatpush.msra.mxu1 %v55_v17  ;;  %133 = vmatpush.msra.mxu2 %v76_v35  ;;  %v64_v53 = vld [vmem:[#allocation2 + $0x108] sm:$0xff]  ;;  %v63_v54 = vld [vmem:[#allocation2 + $0x100] sm:$0xff] }
  0x16   :  { %87 = vmatpush.msra.mxu0 %v38_v14  ;;  %v179_v1 = vld [vmem:[%s253_s2] ss:$0 sm:$0xff] }
  0x17   :  { %113 = vmatpush.msra.mxu1 %v54_v25  ;;  %134 = vmatpush.msra.mxu2 %v75_v36 }
  0x18   :  { %88 = vmatpush.msra.mxu0 %v37_v16 }
  0x19   :  { %114 = vmatpush.msra.mxu1 %v53_v26  ;;  %135 = vmatpush.msra.mxu2 %v74_v37 }
  0x1a   :  { %89 = vmatpush.msra.mxu0 %v36_v18 }
  0x1b   :  { %115 = vmatpush.msra.mxu1 %v52_v27  ;;  %136 = vmatpush.msra.mxu2 %v73_v38 }
  0x1c   :  { %90 = vmatpush.msra.mxu0 %v35_v19 }
  0x1d   :  { %116 = vmatpush.msra.mxu1 %v51_v28  ;;  %137 = vmatpush.msra.mxu2 %v72_v39 }
  0x1e   :  { %91 = vmatpush.msra.mxu0 %v34_v20 }
  0x1f   :  { %117 = vmatpush.msra.mxu1 %v50_v29  ;;  %138 = vmatpush.msra.mxu2 %v71_v40 }
  0x20   :  { %92 = vmatpush.msra.mxu0 %v33_v21 }
  0x21   :  { %118 = vmatpush.msra.mxu1 %v49_v30  ;;  %139 = vmatpush.msra.mxu2 %v70_v47 }
  0x22   :  { %93 = vmatpush.msra.mxu0 %v32_v22 }
  0x23   :  { %119 = vmatpush.msra.mxu1 %v48_v31  ;;  %140 = vmatpush.msra.mxu2 %v69_v48 }
  0x24   :  { %94 = vmatpush.msra.mxu0 %v31_v23 }
  0x25   :  { %95 = vmatmul.f32.vlgmr.msra.gmra.mxu0 %v241_v24  ;;  %120 = vmatpush.msra.mxu1 %v47_v32 }
  0x26   :  { %141 = vmatpush.msra.mxu2 %v68_v49 }
  0x28   :  { %142 = vmatpush.msra.mxu2 %v67_v50 }
  0x2a   :  { %143 = vmatpush.msra.mxu2 %v66_v51 }
  0x2c   :  { %144 = vmatpush.msra.mxu2 %v65_v52 }
  0x2e   :  { %145 = vmatpush.msra.mxu2 %v64_v53 }
  0x30   :  { %146 = vmatpush.msra.mxu2 %v63_v54 }
  0xa2   :  { %v96_v41 = vpop.f32.mrf.mxu0 }
  0xa3   :  { %v100_v42 = vmin.f32 %v96_v41, 0.0  ;;  %vm99_vm0 = vcmp.gt.f32.partialorder %v96_v41, 0.0 }
  0xa5   :  { %v101_v43 = vmul.f32 1.442695, %v100_v42 }
  0xa7   :  { %180 = vpow2.f32 %v101_v43 }
  0xad   :  { %v181_v44 = vpop.eup %180 }
  0xae   :  { %v174_v45 = vadd.f32 -1.0, %v181_v44 }
  0xb0   :  { %v104_v46 = vsel %vm99_vm0, %v96_v41, %v174_v45 }
  0xb1   :  { %121 = vmatmul.f32.vlgmr.msra.gmra.mxu1 %v104_v46 }
 0x12e   :  { %v122_v55 = vpop.f32.mrf.mxu1 }
 0x12f   :  { %v126_v56 = vmin.f32 %v122_v55, 0.0  ;;  %vm125_vm1 = vcmp.gt.f32.partialorder %v122_v55, 0.0 }
 0x131   :  { %v127_v57 = vmul.f32 1.442695, %v126_v56 }
 0x133   :  { %182 = vpow2.f32 %v127_v57 }
 0x139   :  { %v183_v58 = vpop.eup %182 }
 0x13a   :  { %v175_v59 = vadd.f32 -1.0, %v183_v58 }
 0x13c   :  { %v130_v60 = vsel %vm125_vm1, %v122_v55, %v175_v59 }
 0x13d   :  { %147 = vmatmul.f32.vlgmr.msra.gmra.mxu2 %v130_v60 }
 0x1c0   :  { %v148_v62 = vpop.f32.mrf.mxu2 }
 0x1c1   :  { %184 = vtanh.f32 %v148_v62 }
 0x1c7   :  { %v185_v0 = vpop.eup %184 }
 0x1c8   :  { %v155_v2 = vsel %vm153_vm2, %v185_v0, %v148_v62 }
 0x1c9   :  { %v157_v3 = vsub.f32 %v241_v24, %v155_v2 }
 0x1cb   :  { %v161_v4 = vmul.f32 %v179_v1, %v157_v3 }
 0x1cd   :  { %v162_v5 = vmul.f32 %v161_v4, %v161_v4 }
 0x1cf   :  { %163 = vadd.xlane.f32.xlu0 %v162_v5 }
 0x242   :  { %v164_v6 = vpop.xlane.xlu0 %163 }
 0x243   :  { %v165_v7 = vmul.f32 0.5, %v164_v6 }
 0x245   :  { %v167_v8 = vsel %vm166_vm3, %v165_v7, %v155_v2 }
 0x246   :  { %168 = vst [vmem:[%s254_s3] sm:$0xff] %v167_v8 }
 0x247   :  { %173 = vsyncpa [#allocation3], 1 }

</bundles_post_ra>
